<compile_context>
chip_gen: v7x
topology: tpu7x:2x2x1
jax: 0.10.0
libtpu: 0.0.40
codegen_flags: <defaults>
</compile_context>

<pallas_src>
import functools

import jax
import jax.numpy as jnp
from jax.experimental import pallas as pl
from jax.experimental.pallas import tpu as pltpu

LN_EPS = 1e-5  # torch.nn.LayerNorm default


def _round_up(x: int, m: int) -> int:
    return ((x + m - 1) // m) * m


def _row_multiple(dtype) -> int:
    """Row-tile granularity so stores stay unmasked / sublane-dense."""
    itemsize = jnp.dtype(dtype).itemsize
    if itemsize >= 4:
        return 8
    if itemsize == 2:
        return 16   # bf16 packs 2 rows per sublane
    return 32       # 8-bit types pack 4 rows per sublane


def _vmem_budget_bytes() -> int:
    """Per-generation scoped-VMEM budget, leaving headroom for compiler scratch."""
    cap = None
    try:
        cap = int(pltpu.get_tpu_info().vmem_capacity_bytes)
    except Exception:  # capability query only; never masks kernel errors
        cap = None
    if cap is None:
        return 40 * 1024 * 1024                  # unknown chip: safe everywhere
    if cap <= 64 * 1024 * 1024:                  # v7x-class: 64 MiB per TensorCore
        return 44 * 1024 * 1024
    return 100 * 1024 * 1024                     # v5e / v6e: 128 MiB physical


@functools.lru_cache(maxsize=None)
def _single_buffer_supported() -> bool:
    """One-time capability probe for pipeline_mode=pl.Buffered(1) on a tiny throwaway
    kernel.  The real kernel is never wrapped in a broad except, so genuine lowering
    errors (VMEM OOM, layout issues) surface instead of being masked."""
    if not hasattr(pl, "Buffered"):
        return False

    def _probe_kernel(x_ref, o_ref):
        o_ref[...] = x_ref[...]

    try:
        fn = pl.pallas_call(
            _probe_kernel,
            out_shape=jax.ShapeDtypeStruct((8, 128), jnp.float32),
            grid_spec=pltpu.PrefetchScalarGridSpec(
                num_scalar_prefetch=0,
                grid=(1,),
                in_specs=[pl.BlockSpec((8, 128), lambda i: (0, 0),
                                       pipeline_mode=pl.Buffered(1))],
                out_specs=pl.BlockSpec((8, 128), lambda i: (0, 0)),
            ),
        )
        jax.jit(fn).lower(jax.ShapeDtypeStruct((8, 128), jnp.float32)).compile()
        return True
    except Exception:  # capability probe only
        return False


# --------------------------------------------------------------------------------------
# Kernels
# --------------------------------------------------------------------------------------

def _residual_block_kernel(x_ref, w1_ref, w2_ref, vecs_ref, o_ref, *, inv_dim):
    """Resident-weights path: both (d_pad, d_pad) weight matrices live in VMEM."""
    x = x_ref[...]
    b1, b2 = vecs_ref[0:1, :], vecs_ref[1:2, :]
    gamma, beta, mask = vecs_ref[2:3, :], vecs_ref[3:4, :], vecs_ref[4:5, :]

    # fc1 + ReLU (MXU in native dtype, f32 accumulate)
    h = jnp.dot(x, w1_ref[...], preferred_element_type=jnp.float32) + b1
    h = jnp.maximum(h, 0.0)

    # fc2 + residual (f32 vector math)
    out = jnp.dot(h.astype(w2_ref.dtype), w2_ref[...],
                  preferred_element_type=jnp.float32) + b2
    out = out + x.astype(jnp.float32)

    # LayerNorm over the TRUE feature dim (inv_dim = 1/dim), two-pass / numerically safe.
    # Padded lanes of `out` are exactly zero, so the plain sum equals the real-lane sum;
    # the centered sum of squares is masked so feature padding contributes nothing.
    mean = jnp.sum(out, axis=-1, keepdims=True) * inv_dim
    centered = (out - mean) * mask
    var = jnp.sum(centered * centered, axis=-1, keepdims=True) * inv_dim
    y = centered * jax.lax.rsqrt(var + LN_EPS) * gamma + beta   # padded lanes stay 0

    o_ref[...] = jnp.maximum(y, 0.0).astype(o_ref.dtype)


def _residual_block_kernel_ktiled(x_ref, w1_ref, w2_ref, b1_ref, vecs_ref, o_ref,
                                  acc_ref, *, inv_dim):
    """Hidden-dim-tiled path for large D: per k-step stream W1^T[:, k-slab] and
    W2^T[k-slab, :]; acc += relu(x @ W1slab + b1slab) @ W2slab (ReLU is elementwise in the
    hidden dim, so this is exact); residual + LayerNorm + ReLU on the last k step."""
    k = pl.program_id(1)

    @pl.when(k == 0)
    def _():
        acc_ref[...] = jnp.zeros_like(acc_ref)

    x = x_ref[...]
    h = jnp.dot(x, w1_ref[...], preferred_element_type=jnp.float32) + b1_ref[...]
    h = jnp.maximum(h, 0.0)
    acc_ref[...] += jnp.dot(h.astype(w2_ref.dtype), w2_ref[...],
                            preferred_element_type=jnp.float32)

    @pl.when(k == pl.num_programs(1) - 1)
    def _():
        b2, gamma = vecs_ref[1:2, :], vecs_ref[2:3, :]
        beta, mask = vecs_ref[3:4, :], vecs_ref[4:5, :]
        out = acc_ref[...] + b2 + x.astype(jnp.float32)
        mean = jnp.sum(out, axis=-1, keepdims=True) * inv_dim
        centered = (out - mean) * mask
        var = jnp.sum(centered * centered, axis=-1, keepdims=True) * inv_dim
        y = centered * jax.lax.rsqrt(var + LN_EPS) * gamma + beta
        o_ref[...] = jnp.maximum(y, 0.0).astype(o_ref.dtype)


# --------------------------------------------------------------------------------------
# Parameter prep (one-time; NOT per forward)
# --------------------------------------------------------------------------------------

def prepare_params(w1, b1, w2, b2, gamma, beta, *, lane_multiple=None):
    """Transpose PyTorch (out,in) weights to (in,out), zero-pad the feature dim, and fuse
    the 1-D params + lane mask into a single (8, d_pad) f32 operand
    (rows: b1, b2, gamma, beta, mask, 0, 0, 0)."""
    d = w1.shape[0]
    if lane_multiple is None:
        # 256 matches the 2x256x256 MXUs on v6e/v7x (and is still a 128 multiple for v5e);
        # for small dims keep 128 to limit padding waste.
        lane_multiple = 256 if d >= 1024 else 128
    d_pad = _round_up(d, lane_multiple)

    def pad_mat(wt):                       # (d, d) -> (d_pad, d_pad), zero padded
        return jnp.pad(wt, ((0, d_pad - d), (0, d_pad - d)))

    def pad_vec(v):                        # (d,) -> (d_pad,) f32, zero padded
        return jnp.pad(v.astype(jnp.float32), (0, d_pad - d))

    mask = jnp.pad(jnp.ones((d,), jnp.float32), (0, d_pad - d))
    zeros = jnp.zeros((d_pad,), jnp.float32)
    vecs = jnp.stack([pad_vec(b1), pad_vec(b2), pad_vec(gamma), pad_vec(beta),
                      mask, zeros, zeros, zeros], axis=0)

    return {
        "w1_t": pad_mat(w1.T),
        "w2_t": pad_mat(w2.T),
        "b1_row": pad_vec(b1).reshape(1, d_pad),
        "vecs": vecs,
        "dim": d,
        "dim_pad": d_pad,
    }


# --------------------------------------------------------------------------------------
# Tile selection under an explicit VMEM budget
# --------------------------------------------------------------------------------------

def _pick_resident_rows(b_pad, d_pad, x_itemsize, w_itemsize, weight_buffers,
                        budget, row_multiple):
    """Largest row tile whose resident-weights footprint fits the budget; prefer >= 4 grid
    steps (v7x: 2 TCs x >= 2 pipelined steps), then >= 2.  None => weights don't fit."""
    candidates = [c for c in (512, 256, 128, 64, 32, 16, 8) if c % row_multiple == 0]
    weights = weight_buffers * 2 * d_pad * d_pad * w_itemsize
    vecs = 2 * 8 * d_pad * 4

    def fits(bm):
        xo = 2 * 2 * bm * d_pad * x_itemsize      # double-buffered x and out tiles
        temps = 3 * bm * d_pad * 4                # f32 h / out / centered slabs
        return weights + xo + temps + vecs <= budget

    for min_steps in (4, 2, 1):
        for bm in candidates:
            if b_pad % bm == 0 and b_pad // bm >= min_steps and fits(bm):
                return bm
    return None


def _pick_ktiled_tiles(b_pad, d_pad, x_itemsize, w_itemsize, budget, row_multiple):
    """(bm, tk) for the hidden-dim-tiled path, under the same budget formula."""
    bm_cands = [c for c in (512, 256, 128, 64, 32, 16, 8) if c % row_multiple == 0]
    tk_cands = [t for t in (1024, 512, 256, 128) if d_pad % t == 0]

    def fits(bm, tk):
        wslabs = 2 * 2 * d_pad * tk * w_itemsize  # double-buffered W1 / W2 slabs
        xo = 2 * 2 * bm * d_pad * x_itemsize      # x + out tiles
        acc = bm * d_pad * 4                      # accumulator scratch
        temps = bm * tk * 4 + 2 * bm * d_pad * 4  # f32 h slab + finalize temps
        vecs = 2 * 8 * d_pad * 4 + 2 * d_pad * 4
        return wslabs + xo + acc + temps + vecs <= budget

    for min_steps in (4, 2, 1):
        for bm in bm_cands:
            if b_pad % bm != 0 or b_pad // bm < min_steps:
                continue
            for tk in tk_cands:
                if fits(bm, tk):
                    return bm, tk
    return row_multiple, 128


# --------------------------------------------------------------------------------------
# Wrapper
# --------------------------------------------------------------------------------------

def residual_block(x, params, *, block_rows=None, block_hidden=None, force_ktiled=False):
    """x: (B, D) with D == params['dim'].  Matches the PyTorch forward."""
    B, D = x.shape
    assert D == params["dim"], "feature dim mismatch with prepared params"
    d_pad = params["dim_pad"]

    x_itemsize = jnp.dtype(x.dtype).itemsize
    w_itemsize = jnp.dtype(params["w1_t"].dtype).itemsize
    row_mult = _row_multiple(x.dtype)
    budget = _vmem_budget_bytes()
    single_buf = _single_buffer_supported()
    weight_buffers = 1 if single_buf else 2

    # Rows are only rounded up to the sublane granularity (8/16/32), never to the tile.
    b_pad = _round_up(B, row_mult)

    # ---- path + tile selection under the per-generation VMEM budget -------------------
    bm = block_rows
    tk = block_hidden
    use_ktiled = force_ktiled
    if not use_ktiled and bm is None:
        bm = _pick_resident_rows(b_pad, d_pad, x_itemsize, w_itemsize,
                                 weight_buffers, budget, row_mult)
        use_ktiled = bm is None          # full weights don't fit -> hidden-dim tiling
    if use_ktiled:
        auto_bm, auto_tk = _pick_ktiled_tiles(b_pad, d_pad, x_itemsize, w_itemsize,
                                              budget, row_mult)
        bm = bm if bm is not None else auto_bm
        tk = tk if tk is not None else auto_tk
        assert d_pad % tk == 0, "block_hidden must divide the padded feature dim"
    if block_rows is not None:
        b_pad = _round_up(B, bm)         # caller forced a row tile: honor it

    # ---- wrapper pad only when actually needed (extra HBM pass otherwise) -------------
    padded = (b_pad != B) or (d_pad != D)
    x_in = jnp.pad(x, ((0, b_pad - B), (0, d_pad - D))) if padded else x

    cost = pl.CostEstimate(
        flops=4 * b_pad * d_pad * d_pad + 12 * b_pad * d_pad,   # 2 matmuls + elementwise
        transcendentals=b_pad,                                  # one rsqrt per row
        bytes_accessed=(2 * b_pad * d_pad * x_itemsize          # x in, out
                        + 2 * d_pad * d_pad * w_itemsize        # two weight matrices
                        + 8 * d_pad * 4),                       # fused vec bundle
    )
    compiler_params = pltpu.CompilerParams(
        dimension_semantics=(("parallel", "arbitrary") if use_ktiled else ("parallel",)),
        vmem_limit_bytes=budget,
    )

    def _const(shape, index_map):
        # Grid-invariant operands: single-buffer to halve their VMEM footprint.
        if single_buf:
            return pl.BlockSpec(shape, index_map, pipeline_mode=pl.Buffered(1))
        return pl.BlockSpec(shape, index_map)

    if not use_ktiled:
        kernel = functools.partial(_residual_block_kernel, inv_dim=1.0 / D)
        out_p = pl.pallas_call(
            kernel,
            out_shape=jax.ShapeDtypeStruct((b_pad, d_pad), x.dtype),
            grid_spec=pltpu.PrefetchScalarGridSpec(
                num_scalar_prefetch=0,
                grid=(b_pad // bm,),
                in_specs=[
                    pl.BlockSpec((bm, d_pad), lambda i: (i, 0)),        # x tile
                    _const((d_pad, d_pad), lambda i: (0, 0)),           # W1^T
                    _const((d_pad, d_pad), lambda i: (0, 0)),           # W2^T
                    _const((8, d_pad), lambda i: (0, 0)),               # b1/b2/g/b/mask
                ],
                out_specs=pl.BlockSpec((bm, d_pad), lambda i: (i, 0)),
            ),
            compiler_params=compiler_params,
            cost_estimate=cost,
        )(x_in, params["w1_t"], params["w2_t"], params["vecs"])
    else:
        kernel = functools.partial(_residual_block_kernel_ktiled, inv_dim=1.0 / D)
        out_p = pl.pallas_call(
            kernel,
            out_shape=jax.ShapeDtypeStruct((b_pad, d_pad), x.dtype),
            grid_spec=pltpu.PrefetchScalarGridSpec(
                num_scalar_prefetch=0,
                grid=(b_pad // bm, d_pad // tk),
                in_specs=[
                    pl.BlockSpec((bm, d_pad), lambda i, k: (i, 0)),     # x (reused over k)
                    pl.BlockSpec((d_pad, tk), lambda i, k: (0, k)),     # W1^T column slab
                    pl.BlockSpec((tk, d_pad), lambda i, k: (k, 0)),     # W2^T row slab
                    pl.BlockSpec((1, tk), lambda i, k: (0, k)),         # b1 slab
                    _const((8, d_pad), lambda i, k: (0, 0)),            # b2/g/b/mask
                ],
                out_specs=pl.BlockSpec((bm, d_pad), lambda i, k: (i, 0)),
                scratch_shapes=[pltpu.VMEM((bm, d_pad), jnp.float32)],
            ),
            compiler_params=compiler_params,
            cost_estimate=cost,
        )(x_in, params["w1_t"], params["w2_t"], params["b1_row"], params["vecs"])

    return out_p[:B, :D] if padded else out_p


def residual_block_ref(x, w1, b1, w2, b2, gamma, beta):
    """Pure-JAX reference mirroring the PyTorch forward."""
    h = jnp.maximum(x @ w1.T + b1, 0.0)
    out = h @ w2.T + b2
    out = out + x
    mean = jnp.mean(out, axis=-1, keepdims=True)
    var = jnp.mean((out - mean) ** 2, axis=-1, keepdims=True)
    out = (out - mean) / jnp.sqrt(var + LN_EPS) * gamma + beta
    return jnp.maximum(out, 0.0)


if __name__ == "__main__":
    root = jax.random.PRNGKey(0)
    key_a, key_b = jax.random.split(root)

    def make_inputs(key, B, D):
        k_x, k_w1, k_b1, k_w2, k_b2 = jax.random.split(key, 5)
        bound = 1.0 / (D ** 0.5)
        x = jax.random.normal(k_x, (B, D), dtype=jnp.float32)
        w1 = jax.random.uniform(k_w1, (D, D), jnp.float32, -bound, bound)
        b1 = jax.random.uniform(k_b1, (D,), jnp.float32, -bound, bound)
        w2 = jax.random.uniform(k_w2, (D, D), jnp.float32, -bound, bound)
        b2 = jax.random.uniform(k_b2, (D,), jnp.float32, -bound, bound)
        gamma = jnp.ones((D,), jnp.float32)     # nn.LayerNorm init
        beta = jnp.zeros((D,), jnp.float32)
        return x, (w1, b1, w2, b2, gamma, beta)

    # Small-shape test: batch=16, dim=32 (resident-weights path; D padded to 128 lanes).
    x, p = make_inputs(key_a, 16, 32)
    params = prepare_params(*p)
    out = jax.block_until_ready(residual_block(x, params))
    ref = residual_block_ref(x, *p)
    assert out.shape == x.shape
    assert jnp.allclose(out, ref, atol=1e-4, rtol=1e-4), "resident-weights path mismatch"

    # Also exercise the hidden-dim-tiled (K-slab) path on a small shape (2 k-steps).
    x2, p2 = make_inputs(key_b, 16, 160)
    params2 = prepare_params(*p2)              # D=160 -> d_pad=256
    out2 = jax.block_until_ready(
        residual_block(x2, params2, force_ktiled=True, block_hidden=128))
    ref2 = residual_block_ref(x2, *p2)
    assert out2.shape == x2.shape
    assert jnp.allclose(out2, ref2, atol=1e-4, rtol=1e-4), "k-tiled path mismatch"

    print("KERNEL_OK")
</pallas_src>

<mosaic_0001>
module attributes {stable_mosaic.version = 11 : i64} {
  func.func @_residual_block_kernel(%arg0: i32, %arg1: memref<8x128xf32, #tpu.memory_space<vmem>>, %arg2: memref<128x128xf32, #tpu.memory_space<vmem>>, %arg3: memref<128x128xf32, #tpu.memory_space<vmem>>, %arg4: memref<8x128xf32, #tpu.memory_space<vmem>>, %arg5: memref<8x128xf32, #tpu.memory_space<vmem>>) attributes {dimension_semantics = [#tpu.dimension_semantics<parallel>], iteration_bounds = array<i64: 2>, scalar_prefetch = 0 : i64, scratch_operands = 0 : i64, tpu.core_type = #tpu.core_type<tc>, window_params = [{transform_indices = @transform_0, window_bounds = array<i64: 8, 128>}, {pipeline_mode = #tpu.pipeline_mode<synchronous>, transform_indices = @transform_1, window_bounds = array<i64: 128, 128>}, {pipeline_mode = #tpu.pipeline_mode<synchronous>, transform_indices = @transform_2, window_bounds = array<i64: 128, 128>}, {pipeline_mode = #tpu.pipeline_mode<synchronous>, transform_indices = @transform_3, window_bounds = array<i64: 8, 128>}, {transform_indices = @transform_4, window_bounds = array<i64: 8, 128>}]} {
    %c0 = arith.constant 0 : index
    %c0_0 = arith.constant 0 : index
    %0 = vector.load %arg1[%c0, %c0_0] : memref<8x128xf32, #tpu.memory_space<vmem>>, vector<8x128xf32>
    %c0_1 = arith.constant 0 : index
    %c0_2 = arith.constant 0 : index
    %1 = vector.load %arg4[%c0_1, %c0_2] : memref<8x128xf32, #tpu.memory_space<vmem>>, vector<1x128xf32>
    %c1 = arith.constant 1 : index
    %c0_3 = arith.constant 0 : index
    %2 = vector.load %arg4[%c1, %c0_3] : memref<8x128xf32, #tpu.memory_space<vmem>>, vector<1x128xf32>
    %c2 = arith.constant 2 : index
    %c0_4 = arith.constant 0 : index
    %3 = vector.load %arg4[%c2, %c0_4] : memref<8x128xf32, #tpu.memory_space<vmem>>, vector<1x128xf32>
    %c3 = arith.constant 3 : index
    %c0_5 = arith.constant 0 : index
    %4 = vector.load %arg4[%c3, %c0_5] : memref<8x128xf32, #tpu.memory_space<vmem>>, vector<1x128xf32>
    %c4 = arith.constant 4 : index
    %c0_6 = arith.constant 0 : index
    %5 = vector.load %arg4[%c4, %c0_6] : memref<8x128xf32, #tpu.memory_space<vmem>>, vector<1x128xf32>
    %c0_7 = arith.constant 0 : index
    %c0_8 = arith.constant 0 : index
    %6 = vector.load %arg2[%c0_7, %c0_8] : memref<128x128xf32, #tpu.memory_space<vmem>>, vector<128x128xf32>
    %cst = arith.constant dense<0.000000e+00> : vector<8x128xf32>
    %7 = tpu.matmul %0, %6, %cst {dimension_numbers = #tpu.dot_dimension_numbers<[1], [0], [0], [1], [0, 0, 1, 1], [], []>} : vector<8x128xf32>, vector<128x128xf32>, vector<8x128xf32> -> vector<8x128xf32>
    %8 = vector.broadcast %1 : vector<1x128xf32> to vector<8x128xf32>
    %9 = arith.addf %7, %8 : vector<8x128xf32>
    %cst_9 = arith.constant 0.000000e+00 : f32
    %10 = vector.broadcast %cst_9 : f32 to vector<8x128xf32>
    %11 = arith.maximumf %9, %10 : vector<8x128xf32>
    %c0_10 = arith.constant 0 : index
    %c0_11 = arith.constant 0 : index
    %12 = vector.load %arg3[%c0_10, %c0_11] : memref<128x128xf32, #tpu.memory_space<vmem>>, vector<128x128xf32>
    %cst_12 = arith.constant dense<0.000000e+00> : vector<8x128xf32>
    %13 = tpu.matmul %11, %12, %cst_12 {dimension_numbers = #tpu.dot_dimension_numbers<[1], [0], [0], [1], [0, 0, 1, 1], [], []>} : vector<8x128xf32>, vector<128x128xf32>, vector<8x128xf32> -> vector<8x128xf32>
    %14 = vector.broadcast %2 : vector<1x128xf32> to vector<8x128xf32>
    %15 = arith.addf %13, %14 : vector<8x128xf32>
    %16 = arith.addf %15, %0 : vector<8x128xf32>
    %cst_13 = arith.constant dense<0.000000e+00> : vector<8xf32>
    %17 = vector.multi_reduction <add>, %16, %cst_13 [1] : vector<8x128xf32> to vector<8xf32>
    %18 = vector.shape_cast %17 : vector<8xf32> to vector<8x1xf32>
    %cst_14 = arith.constant 3.125000e-02 : f32
    %19 = vector.broadcast %cst_14 : f32 to vector<8x1xf32>
    %20 = arith.mulf %18, %19 : vector<8x1xf32>
    %21 = vector.broadcast %20 : vector<8x1xf32> to vector<8x128xf32>
    %22 = arith.subf %16, %21 : vector<8x128xf32>
    %23 = vector.broadcast %5 : vector<1x128xf32> to vector<8x128xf32>
    %24 = arith.mulf %22, %23 : vector<8x128xf32>
    %25 = arith.mulf %24, %24 : vector<8x128xf32>
    %cst_15 = arith.constant dense<0.000000e+00> : vector<8xf32>
    %26 = vector.multi_reduction <add>, %25, %cst_15 [1] : vector<8x128xf32> to vector<8xf32>
    %27 = vector.shape_cast %26 : vector<8xf32> to vector<8x1xf32>
    %cst_16 = arith.constant 3.125000e-02 : f32
    %28 = vector.broadcast %cst_16 : f32 to vector<8x1xf32>
    %29 = arith.mulf %27, %28 : vector<8x1xf32>
    %cst_17 = arith.constant 9.99999974E-6 : f32
    %30 = vector.broadcast %cst_17 : f32 to vector<8x1xf32>
    %31 = arith.addf %29, %30 : vector<8x1xf32>
    %32 = math.rsqrt %31 : vector<8x1xf32>
    %33 = vector.broadcast %32 : vector<8x1xf32> to vector<8x128xf32>
    %34 = arith.mulf %24, %33 : vector<8x128xf32>
    %35 = vector.broadcast %3 : vector<1x128xf32> to vector<8x128xf32>
    %36 = arith.mulf %34, %35 : vector<8x128xf32>
    %37 = vector.broadcast %4 : vector<1x128xf32> to vector<8x128xf32>
    %38 = arith.addf %36, %37 : vector<8x128xf32>
    %cst_18 = arith.constant 0.000000e+00 : f32
    %39 = vector.broadcast %cst_18 : f32 to vector<8x128xf32>
    %40 = arith.maximumf %38, %39 : vector<8x128xf32>
    %c0_19 = arith.constant 0 : index
    %c0_20 = arith.constant 0 : index
    %41 = vector.load %arg5[%c0_19, %c0_20] : memref<8x128xf32, #tpu.memory_space<vmem>>, vector<8x128xf32>
    tpu.vector_store %arg5[%c0_19, %c0_20], %40 {strides = array<i32>} : memref<8x128xf32, #tpu.memory_space<vmem>>, vector<8x128xf32>,
    return
  }
  func.func @transform_0(%arg0: i32) -> (i32, i32) {
    %c0_i32 = arith.constant 0 : i32
    %c0_i32_0 = arith.constant 0 : i32
    return %arg0, %c0_i32 : i32, i32
  }
  func.func @transform_1(%arg0: i32) -> (i32, i32) {
    %c0_i32 = arith.constant 0 : i32
    %c0_i32_0 = arith.constant 0 : i32
    %c0_i32_1 = arith.constant 0 : i32
    return %c0_i32, %c0_i32_0 : i32, i32
  }
  func.func @transform_2(%arg0: i32) -> (i32, i32) {
    %c0_i32 = arith.constant 0 : i32
    %c0_i32_0 = arith.constant 0 : i32
    %c0_i32_1 = arith.constant 0 : i32
    return %c0_i32, %c0_i32_0 : i32, i32
  }
  func.func @transform_3(%arg0: i32) -> (i32, i32) {
    %c0_i32 = arith.constant 0 : i32
    %c0_i32_0 = arith.constant 0 : i32
    %c0_i32_1 = arith.constant 0 : i32
    return %c0_i32, %c0_i32_0 : i32, i32
  }
  func.func @transform_4(%arg0: i32) -> (i32, i32) {
    %c0_i32 = arith.constant 0 : i32
    %c0_i32_0 = arith.constant 0 : i32
    return %arg0, %c0_i32 : i32, i32
  }
}

</mosaic_0001>

<bundles_post_ra>
// kernel: tpu_custom_call.1
= control target key start
LH: loop header
LB: loop body
LE: loop exit
PB: predicated region body
PF: predicated region fallthrough
CT: control target
= control target key end

     0   :  { %9 = vsyncpa [#allocation3], 0  ;;  %s1267_s0 = inlined_call_operand.hbm [shape: f32[16,128], index: 0, kind: input, shape index: {}]   ;;  %s1268_s1 = inlined_call_operand.hbm [shape: f32[128,128], index: 1, kind: input, shape index: {}]   ;;  %s1269_s2 = inlined_call_operand.hbm [shape: f32[128,128], index: 2, kind: input, shape index: {}]   ;;  %s1270_s3 = inlined_call_operand.vmem [shape: f32[8,128], index: 3, kind: input, shape index: {}]   ;;  %s1271_s4 = inlined_call_operand.hbm [shape: f32[16,128], index: 4, kind: output, shape index: {}]  }
   0x1   :  { %11 = vsyncpa [#allocation3 + $0x1], 0 }
   0x2   :  { %12 = vsyncpa [#allocation6], 0 }
   0x3   :  { %13 = vsyncpa [#allocation4], 0 }
   0x4   :  { %15 = vsyncpa [#allocation4 + $0x1], 0  ;;  %s1000_s15 = smov 0   ;;  %s1002_s16 = smov 0  }
   0x5   :  { %s1004_s17 = smov 0   ;;  %s1006_s18 = smov 0  }
   0x6 LB: > { %s1021_s19 = sadd.s32 4294967295, %s964_s18   ;;  %s561_s20 = sadd.s32 4294967294, %s964_s18   ;;  %s964_s18 = sphi %s1006_s18, %s1291_s18   ;;  %s960_s17 = sphi %s1004_s17, %s1290_s17   ;;  %s956_s16 = sphi %s1002_s16, %s1289_s16   ;;  %s952_s15 = sphi %s1000_s15, %s1288_s15  }
   0x7   : > { %p41_p0 = scmp.ne.s32.totalorder %s956_s16, %s952_s15  ;;  %p1272_p1 = scmp.eq.s32.totalorder %s1021_s19, 0 }
   0x8   : > { %p134_p3 = scmp.eq.s32.totalorder %s561_s20, 1  ;;  %p562_p5 = scmp.ge.s32.totalorder %s964_s18, 1 }
   0x9   : > { %p1030_p4 = por %p1272_p1, %p41_p0  ;;  %p141_p7 = scmp.lt.s32.totalorder %s964_s18, 3 }
   0xa   : > { %p1035_p6 = por %p134_p3, %p41_p0  ;;  %s966_s24 = smov [#allocation5]  }
   0xb   : > { %s1275_s21 = scalar_select %p1030_p4, 1, 0 }
   0xc   : > { %s1276_s22 = scalar_select %p1035_p6, 1, 0 }
   0xd   : > { %p1040_p8 = pnand %p562_p5, %p141_p7  ;;  %s153_s25 = sshll.u32 %s966_s24, 4  ;;  %s1044_s25 = int_to_ptr.vmem [resolvable:$true] %s153_s25 }
   0xe   : > { %s967_s27 = smov [#allocation7]   ;;  %s808_s5 = scalar_lea.hbm %s1268_s1, 2048 }
   0xf   : > { %p746_p9 = pneg %p1040_p8  ;;  %s166_s28 = sshll.u32 %s967_s27, 4  ;;  %s1055_s28 = int_to_ptr.vmem [resolvable:$true] %s166_s28 }
  0x10   : > { %p809_p12 = scmp.ne.s32.totalorder %s1268_s1, %s808_s5  ;;  %p815_p5 = scmp.lt.u32.totalorder %s808_s5, %s1268_s1 }
  0x11   : > { %p1051_p11 = pnand %p746_p9, %p1272_p1 }
  0x13   : > { %p810_p13 = pneg %p1051_p11 }
  0x15   : > { %p811_p0 = pnand %p810_p13, %p809_p12 }
  0x17   : > { %p812_p3 = pneg %p811_p0 }
  0x19   : > { %p817_p7 = pnand %p815_p5, %p812_p3 }
  0x1b   : > { %820 = shalt.err (!%p817_p7)
}
  0x1c   : > { %s821_s10 = scalar_lea.vmem %s1044_s25, 2048  ;;  %p829_p2 = scmp.lt.s32.totalorder %s1044_s25, %s1044_s25 }
  0x1d   : > { %p822_p9 = scmp.ne.s32.totalorder %s1044_s25, %s821_s10  ;;  %p830_p12 = scmp.lt.s32.totalorder %s821_s10, %s821_s10 }
  0x1f   : > { %p824_p10 = pnand %p822_p9, %p810_p13  ;;  %p831_p0 = por %p830_p12, %p829_p2 }
  0x21   : > { %p825_p1 = pneg %p824_p10 }
  0x23   : > { %p832_p6 = pnand %p831_p0, %p825_p1 }
  0x25   : > { %835 = shalt.err (!%p832_p6)
}
  0x26   : > { %s968_s11 = smov 128   ;;  %s969_s12 = smov 8  }
  0x27   : > { %749 = dma.hbm_to_vmem [thread:$0]  (!%p1051_p11), %s1268_s1, 2048, %s1044_s25, [#allocation6], %s968_s11, %s968_s11, %s969_s12  }
  0x28   : > { %s836_s27 = scalar_lea.hbm %s1269_s2, 2048 }
  0x29   : > { %p837_p2 = scmp.ne.s32.totalorder %s1269_s2, %s836_s27  ;;  %p843_p10 = scmp.lt.u32.totalorder %s836_s27, %s1269_s2 }
  0x2b   : > { %p839_p1 = pnand %p837_p2, %p810_p13 }
  0x2d   : > { %p840_p6 = pneg %p839_p1 }
  0x2f   : > { %p845_p3 = pnand %p843_p10, %p840_p6 }
  0x31   : > { %848 = shalt.err (!%p845_p3)
}
  0x32   : > { %s849_s25 = scalar_lea.vmem %s1055_s28, 2048  ;;  %p857_p12 = scmp.lt.s32.totalorder %s1055_s28, %s1055_s28 }
  0x33   : > { %p850_p5 = scmp.ne.s32.totalorder %s1055_s28, %s849_s25  ;;  %p858_p0 = scmp.lt.s32.totalorder %s849_s25, %s849_s25 }
  0x35   : > { %p852_p7 = pnand %p850_p5, %p810_p13  ;;  %p859_p2 = por %p858_p0, %p857_p12 }
  0x37   : > { %p853_p9 = pneg %p852_p7 }
  0x39   : > { %p860_p1 = pnand %p859_p2, %p853_p9 }
  0x3b   : > { %863 = shalt.err (!%p860_p1)
}
  0x3c   : > { %752 = dma.hbm_to_vmem [thread:$0]  (!%p1051_p11), %s1269_s2, 2048, %s1055_s28, [#allocation6], %s968_s11, %s968_s11, %s969_s12  }
  0x3d   : > { %s1110_s9 = sadd.s32 1, %s964_s18   ;;  %s28_s26 = sadd.s32 1, %s960_s17 }
  0x3e   : > { %s25_s10 = ssub.s32 %s964_s18, %s1110_s9  ;;  %p35_p13 = scmp.ne.s32.totalorder %s960_s17, %s956_s16 }
  0x3f   : > { %p26_p6 = scmp.eq.s32.totalorder %s25_s10, 0  ;;  %p36_p10 = scmp.eq.s32.totalorder %s964_s18, 0 }
  0x40   : > { %p1279_p3 = scmp.eq.s32.totalorder %s1021_s19, 1  ;;  %p763_p7 = scmp.lt.s32.totalorder %s964_s18, 2 }
  0x41   : > { %s1126_s14 = scalar_select %p26_p6, %s960_s17, %s28_s26  }
  0x42   : > { %p1120_p5 = por %p1279_p3, %p35_p13  ;;  %p37_p9 = por %p36_p10, %p35_p13 }
  0x43   : > { %s183_s20 = sand.u32 1, %s960_s17   ;;  %s567_s28 = sshll.u32 %s964_s18, 7 }
  0x44   : > { %s1280_s13 = scalar_select %p1120_p5, 1, 0 }
  0x45   : > { %s566_s24 = sshll.u32 %s183_s20, 3  ;;  %s1133_s27 = scalar_lea.hbm %s1267_s0, %s567_s28 }
  0x46   : > { %s187_s29 = scalar_lea.vmem [#allocation2], %s566_s24  ;;  %p1137_p11 = pnand %p763_p7, %p37_p9 }
  0x47   : > { %s194_s30 = sshll.u32 %s187_s29, 4  ;;  %s184_s6 = scalar_lea.sflag [#allocation3], %s183_s20  ;;  %s1135_s30 = int_to_ptr.vmem [resolvable:$true] %s194_s30 }
  0x48   : > { %s864_s25 = scalar_lea.hbm %s1133_s27, 128  ;;  %p866_p0 = pneg %p1137_p11 }
  0x49   : > { %p865_p12 = scmp.ne.s32.totalorder %s1133_s27, %s864_s25  ;;  %s869_s26 = scalar_lea.hbm %s1267_s0, 256 }
  0x4a   : > { %p870_p13 = scmp.lt.u32.totalorder %s1133_s27, %s1267_s0  ;;  %p871_p6 = scmp.lt.u32.totalorder %s869_s26, %s864_s25 }
  0x4b   : > { %p867_p2 = pnand %p866_p0, %p865_p12  ;;  %p873_p3 = scmp.lt.u32.totalorder %s864_s25, %s1133_s27 }
  0x4c   : > { %p872_p10 = por %p871_p6, %p870_p13 }
  0x4d   : > { %p868_p1 = pneg %p867_p2 }
  0x4e   : > { %p874_p7 = por %p873_p3, %p872_p10 }
  0x50   : > { %p875_p9 = pnand %p874_p7, %p868_p1 }
  0x52   : > { %878 = shalt.err (!%p875_p9)
}
  0x53   : > { %s879_s20 = scalar_lea.vmem %s1135_s30, 128  ;;  %s970_s28 = smov [#allocation2]  }
  0x54   : > { %p880_p12 = scmp.ne.s32.totalorder %s1135_s30, %s879_s20  ;;  %s884_s11 = sshll.u32 %s970_s28, 4  ;;  %s885_s11 = int_to_ptr.vmem [resolvable:$false] %s884_s11 }
  0x55   : > { %s886_s12 = scalar_lea.vmem %s885_s11, 256  ;;  %p887_p4 = scmp.lt.s32.totalorder %s1135_s30, %s885_s11 }
  0x56   : > { %p882_p2 = pnand %p880_p12, %p866_p0  ;;  %p888_p13 = scmp.lt.s32.totalorder %s886_s12, %s879_s20 }
  0x58   : > { %p883_p5 = pneg %p882_p2  ;;  %p889_p6 = por %p888_p13, %p887_p4 }
  0x5a   : > { %p890_p10 = pnand %p889_p6, %p883_p5 }
  0x5c   : > { %893 = shalt.err (!%p890_p10)
}
  0x5d   : > { %756 = dma.hbm_to_vmem [thread:$0]  (!%p1137_p11), %s1133_s27, 128, %s1135_s30, %s184_s6  }
  0x5e   : > { %203 = sbr.rel (%p1040_p8) target bundleno = 900 (0x384), region = 36  ;;  %s1169_s29 = sand.u32 (!%p1040_p8), 1, %s956_s16  }
  0x5f   : > { %s569_s25 = sshll.u32 (!%p1040_p8), %s1169_s29, 3  ;;  %s206_s7 = scalar_lea.sflag (!%p1040_p8), [#allocation3], %s1169_s29 }
  0x60   : > { %s1175_s8 = scalar_lea.vmem (!%p1040_p8), [#allocation2], %s569_s25  ;;  %p1282_p4 = scmp.ne.s32.totalorder (!%p1040_p8), %s1275_s21, 0 }
  0x65   : > { %939 = dma.done.wait (%p1282_p4), %s206_s7, 128  }
  0x66   : > { %941 = vsyncadd (%p1282_p4), %s206_s7, 4294967168  ;;  %p1283_p5 = scmp.eq.s32.totalorder %s1021_s19, 0 }
  0x68   : > { %943 = dma.done.wait (%p1283_p5), [#allocation6], 4096   ;;  %p1284_p8 = pmov %p1283_p5 }
  0x69   : > { %v971_v0 = vmov 0.0|0.0   ;;  %vm972_vm0 = vmmov 0   ;;  %v973_v1 = vmov 0.0   ;;  %v248_v2 = vld [vmem:[#allocation5] sm:$0xff]  ;;  %v249_v3 = vld [vmem:[#allocation5 + $0x8] sm:$0xff]  ;;  %v250_v4 = vld [vmem:[#allocation5 + $0x10] sm:$0xff] }
  0x6a   : > { %945 = vsyncadd (%p1284_p8), [#allocation6], 4294963200  ;;  %686 = vmatprep.subr.bf16.mxu0 %v971_v0  ;;  %648 = vmatprep.mubr.msk.f32.mxu0 %vm972_vm0, %v973_v1  ;;  %v687_v5 = vpack.c.bf16 %v249_v3, %v248_v2  ;;  %v251_v6 = vld [vmem:[#allocation5 + $0x18] sm:$0xff]  ;;  %v252_v8 = vld [vmem:[#allocation5 + $0x20] sm:$0xff]  ;;  %s579_s28 = sshll.u32 %s1021_s19, 7  ;;  %s241_s11 = scalar_lea.vmem [#allocation8], %s569_s25 }
  0x6b   : > { %710 = vmatprep.subr.bf16.mxu1 %v971_v0  ;;  %683 = vmatprep.mubr.msk.f32.mxu1 %vm972_vm0, %v973_v1  ;;  %v690_v7 = vpack.c.bf16 %v251_v6, %v250_v4  ;;  %v253_v9 = vld [vmem:[#allocation5 + $0x28] sm:$0xff]  ;;  %v339_v10 = vld [vmem:[#allocation7] sm:$0xff]  ;;  %v341_v12 = vld [vmem:[#allocation7 + $0x10] sm:$0xff]  ;;  %s472_s12 = sshll.u32 %s241_s11, 4  ;;  %s1223_s21 = scalar_lea.hbm %s1271_s4, %s579_s28  ;;  %s1225_s12 = int_to_ptr.vmem [resolvable:$true] %s472_s12 }
  0x6c   : > { %688 = vmatpush3.bf16.msra.mxu0 %v687_v5  ;;  %v340_v11 = vld [vmem:[#allocation7 + $0x8] sm:$0xff]  ;;  %v342_v13 = vld [vmem:[#allocation7 + $0x18] sm:$0xff]  ;;  %v693_v14 = vpack.c.bf16 %v253_v9, %v252_v8  ;;  %v254_v16 = vld [vmem:[#allocation5 + $0x30] sm:$0xff]  ;;  %s459_s23 = scalar_lea.sflag [#allocation4], %s1169_s29  ;;  %s894_s27 = scalar_lea.vmem %s1225_s12, 128 }
  0x6d   : > { %689 = vmatprep.subr.bf16.mxu0 %v971_v0  ;;  %v711_v15 = vpack.c.bf16 %v340_v11, %v339_v10  ;;  %v255_v17 = vld [vmem:[#allocation5 + $0x38] sm:$0xff]  ;;  %v714_v18 = vpack.c.bf16 %v342_v13, %v341_v12  ;;  %v343_v19 = vld [vmem:[#allocation7 + $0x20] sm:$0xff]  ;;  %v344_v20 = vld [vmem:[#allocation7 + $0x28] sm:$0xff]  ;;  %p895_p11 = scmp.ne.s32.totalorder %s1225_s12, %s894_s27  ;;  %p1285_p0 = scmp.ne.s32.totalorder %s1280_s13, 0 }
  0x6e   : > { %v696_v21 = vpack.c.bf16 %v255_v17, %v254_v16  ;;  %v256_v22 = vld [vmem:[#allocation5 + $0x40] sm:$0xff]  ;;  %v257_v23 = vld [vmem:[#allocation5 + $0x48] sm:$0xff]  ;;  %v717_v24 = vpack.c.bf16 %v344_v20, %v343_v19  ;;  %v345_v25 = vld [vmem:[#allocation7 + $0x30] sm:$0xff]  ;;  %s974_s19 = smov [#allocation8]  }
  0x6f   : > { %712 = vmatpush3.bf16.msra.mxu1 %v711_v15  ;;  %v346_v26 = vld [vmem:[#allocation7 + $0x38] sm:$0xff]  ;;  %v699_v27 = vpack.c.bf16 %v257_v23, %v256_v22  ;;  %v258_v28 = vld [vmem:[#allocation5 + $0x50] sm:$0xff]  ;;  %v347_v31 = vld [vmem:[#allocation7 + $0x40] sm:$0xff]  ;;  %p896_p1 = pnand %p895_p11, %p1285_p0  ;;  %s898_s25 = sshll.u32 %s974_s19, 4  ;;  %s899_s25 = int_to_ptr.vmem [resolvable:$false] %s898_s25 }
  0x70   : > { %691 = vmatpush3.bf16.msra.mxu0 %v690_v7  ;;  %713 = vmatprep.subr.bf16.mxu1 %v971_v0  ;;  %v259_v29 = vld [vmem:[#allocation5 + $0x58] sm:$0xff]  ;;  %v720_v30 = vpack.c.bf16 %v346_v26, %v345_v25  ;;  %v348_v32 = vld [vmem:[#allocation7 + $0x48] sm:$0xff]  ;;  %v260_v34 = vld [vmem:[#allocation5 + $0x60] sm:$0xff]  ;;  %s900_s30 = scalar_lea.vmem %s899_s25, 256  ;;  %p901_p7 = scmp.lt.s32.totalorder %s1225_s12, %s899_s25 }
  0x71   : > { %692 = vmatprep.subr.bf16.mxu0 %v971_v0  ;;  %v702_v33 = vpack.c.bf16 %v259_v29, %v258_v28  ;;  %v261_v35 = vld [vmem:[#allocation5 + $0x68] sm:$0xff]  ;;  %v723_v36 = vpack.c.bf16 %v348_v32, %v347_v31  ;;  %v349_v37 = vld [vmem:[#allocation7 + $0x50] sm:$0xff]  ;;  %v350_v38 = vld [vmem:[#allocation7 + $0x58] sm:$0xff]  ;;  %p897_p3 = pneg %p896_p1  ;;  %p902_p9 = scmp.lt.s32.totalorder %s900_s30, %s894_s27 }
  0x72   : > { %v705_v39 = vpack.c.bf16 %v261_v35, %v260_v34  ;;  %v262_v40 = vld [vmem:[#allocation5 + $0x70] sm:$0xff]  ;;  %v263_v41 = vld [vmem:[#allocation5 + $0x78] sm:$0xff]  ;;  %v726_v42 = vpack.c.bf16 %v350_v38, %v349_v37  ;;  %v351_v43 = vld [vmem:[#allocation7 + $0x60] sm:$0xff] }
  0x73   : > { %715 = vmatpush3.bf16.msra.mxu1 %v714_v18  ;;  %v352_v44 = vld [vmem:[#allocation7 + $0x68] sm:$0xff]  ;;  %v708_v45 = vpack.c.bf16 %v263_v41, %v262_v40  ;;  %v242_v47 = vld [vmem:[%s1175_s8] sm:$0xff]  ;;  %p903_p12 = por %p902_p9, %p901_p7 }
  0x74   : > { %694 = vmatpush3.bf16.msra.mxu0 %v693_v14  ;;  %716 = vmatprep.subr.bf16.mxu1 %v971_v0  ;;  %v729_v46 = vpack.c.bf16 %v352_v44, %v351_v43  ;;  %v353_v48 = vld [vmem:[#allocation7 + $0x70] sm:$0xff]  ;;  %v354_v49 = vld [vmem:[#allocation7 + $0x78] sm:$0xff] }
  0x75   : > { %695 = vmatprep.subr.bf16.mxu0 %v971_v0  ;;  %v732_v50 = vpack.c.bf16 %v354_v49, %v353_v48  ;;  %v573_v51 = vld [vmem:[%s1270_s3] ss:$0 sm:$0xff]  ;;  %v574_v56 = vld [vmem:[%s1270_s3 + $0x1] ss:$0 sm:$0xff]  ;;  %v575_v63 = vld [vmem:[%s1270_s3 + $0x4] ss:$0 sm:$0xff]  ;;  %p904_p2 = pnand %p903_p12, %p897_p3 }
  0x76   : > { %v576_v7 = vld [vmem:[%s1270_s3 + $0x2] ss:$0 sm:$0xff]  ;;  %v577_v9 = vld [vmem:[%s1270_s3 + $0x3] ss:$0 sm:$0xff] }
  0x77   : > { %718 = vmatpush3.bf16.msra.mxu1 %v717_v24 }
  0x78   : > { %697 = vmatpush3.bf16.msra.mxu0 %v696_v21  ;;  %719 = vmatprep.subr.bf16.mxu1 %v971_v0 }
  0x79   : > { %698 = vmatprep.subr.bf16.mxu0 %v971_v0 }
  0x7b   : > { %721 = vmatpush3.bf16.msra.mxu1 %v720_v30 }
  0x7c   : > { %700 = vmatpush3.bf16.msra.mxu0 %v699_v27  ;;  %722 = vmatprep.subr.bf16.mxu1 %v971_v0 }
  0x7d   : > { %701 = vmatprep.subr.bf16.mxu0 %v971_v0 }
  0x7f   : > { %724 = vmatpush3.bf16.msra.mxu1 %v723_v36 }
  0x80   : > { %703 = vmatpush3.bf16.msra.mxu0 %v702_v33  ;;  %725 = vmatprep.subr.bf16.mxu1 %v971_v0 }
  0x81   : > { %704 = vmatprep.subr.bf16.mxu0 %v971_v0 }
  0x83   : > { %727 = vmatpush3.bf16.msra.mxu1 %v726_v42 }
  0x84   : > { %706 = vmatpush3.bf16.msra.mxu0 %v705_v39  ;;  %728 = vmatprep.subr.bf16.mxu1 %v971_v0 }
  0x85   : > { %707 = vmatprep.subr.bf16.mxu0 %v971_v0 }
  0x87   : > { %730 = vmatpush3.bf16.msra.mxu1 %v729_v46 }
  0x88   : > { %709 = vmatpush3.bf16.msra.mxu0 %v708_v45  ;;  %731 = vmatprep.subr.bf16.mxu1 %v971_v0 }
  0x8b   : > { %649 = vmatmul.mubr.f32.vlgmr.msra.gmra.mrb[0].mxu0 %v242_v47  ;;  %733 = vmatpush3.bf16.msra.mxu1 %v732_v50 }
 0x15e   : > { %v334_v52 = vpop.f32.mrb[0].mxu0 }
 0x15f   : > { %v335_v53 = vadd.f32 %v573_v51, %v334_v52  ;;  %v650_v54 = vpop.f32.mrb[1].mxu0 }
 0x161   : > { %v338_v55 = vmax.f32 %v335_v53, 0.0 }
 0x163   : > { %684 = vmatmul.mubr.f32.vlgmr.msra.gmra.mrb[0].mxu1 %v338_v55 }
 0x236   : > { %v425_v57 = vpop.f32.mrb[0].mxu1 }
 0x237   : > { %v426_v58 = vadd.f32 %v574_v56, %v425_v57  ;;  %v685_v59 = vpop.f32.mrb[1].mxu1 }
 0x239   : > { %v429_v60 = vadd.f32 %v426_v58, %v242_v47 }
 0x23b   : > { %430 = vadd.xlane.f32.xlu0 %v429_v60 }
 0x2c8   : > { %v431_v61 = vpop.xlane.xlu0 %430 }
 0x2c9   : > { %v432_v62 = vmul.f32 0.03125, %v431_v61 }
 0x2cb   : > { %v433_v0 = vsub.f32 %v429_v60, %v432_v62 }
 0x2cd   : > { %v438_v1 = vmul.f32 %v575_v63, %v433_v0 }
 0x2cf   : > { %v439_v2 = vmul.f32 %v438_v1, %v438_v1 }
 0x2d1   : > { %440 = vadd.xlane.f32.xlu0 %v439_v2 }
 0x35e   : > { %v441_v3 = vpop.xlane.xlu0 %440 }
 0x35f   : > { %v442_v4 = vmul.f32 0.03125, %v441_v3 }
 0x361   : > { %v443_v5 = vadd.f32 1e-05, %v442_v4 }
 0x363   : > { %806 = vrsqrt.f32 %v443_v5 }
 0x36d   : > { %v807_v6 = vpop.eup %806 }
 0x36e   : > { %v445_v8 = vmul.f32 %v807_v6, %v438_v1 }
 0x370   : > { %v450_v10 = vmul.f32 %v576_v7, %v445_v8 }
 0x372   : > { %v455_v11 = vadd.f32 %v577_v9, %v450_v10 }
 0x374   : > { %v456_v12 = vmax.f32 %v455_v11, 0.0 }
 0x376   : > { %457 = vst [vmem:[%s241_s11] sm:$0xff] %v456_v12 }
 0x377   : > { %907 = shalt.err (!%p904_p2)
}
 0x378   : > { %s908_s29 = scalar_lea.hbm %s1223_s21, 128  ;;  %s912_s26 = scalar_lea.hbm %s1271_s4, 256 }
 0x379   : > { %p909_p13 = scmp.ne.s32.totalorder %s1223_s21, %s908_s29  ;;  %p913_p4 = scmp.lt.u32.totalorder %s1223_s21, %s1271_s4 }
 0x37a   : > { %p914_p5 = scmp.lt.u32.totalorder %s912_s26, %s908_s29  ;;  %p916_p11 = scmp.lt.u32.totalorder %s908_s29, %s1223_s21 }
 0x37b   : > { %p910_p6 = pnand %p909_p13, %p1285_p0 }
 0x37c   : > { %p915_p8 = por %p914_p5, %p913_p4 }
 0x37d   : > { %p911_p10 = pneg %p910_p6 }
 0x37e   : > { %p917_p1 = por %p916_p11, %p915_p8 }
 0x380   : > { %p918_p3 = pnand %p917_p1, %p911_p10 }
 0x382   : > { %921 = shalt.err (!%p918_p3)
}
 0x383   : > { %744 = dma.vmem_to_hbm [thread:$0]  (%p1285_p0), %s1225_s12, 128, %s1223_s21, %s459_s23  }
 0x384 PF: > { %s484_s20 = sand.u32 1, %s952_s15   ;;  %p1286_p7 = scmp.ne.s32.totalorder %s1276_s22, 0 }
 0x385   : > { %p1287_p9 = scmp.ge.s32.totalorder %s964_s18, 2  ;;  %s485_s28 = scalar_lea.sflag [#allocation4], %s484_s20 }
 0x387   : > { %p758_p12 = pnand %p1287_p9, %p1286_p7 }
 0x389   : > { %947 = dma.done.wait (!%p758_p12), %s485_s28, 128  }
 0x38a   : > { %949 = vsyncadd (!%p758_p12), %s485_s28, 4294967168  ;;  %p18_p2 = scmp.ge.s32.totalorder %s1110_s9, 4   ;;  %s1288_s15 = smov %s956_s16 }
 0x38b   : > { %s1289_s16 = smov %s960_s17  ;;  %s1290_s17 = smov %s1126_s14 }
 0x38c   : > { %s1291_s18 = smov %s1110_s9  ;;  %20 = sbr.rel (!%p18_p2) target bundleno = 6 (0x6), region = 89 }
 0x393   :  { %490 = vsyncpa [#allocation3], 1 }
 0x394   :  { %492 = vsyncpa [#allocation3 + $0x1], 1 }
 0x395   :  { %493 = vsyncpa [#allocation6], 1 }
 0x396   :  { %494 = vsyncpa [#allocation4], 1 }
 0x397   :  { %496 = vsyncpa [#allocation4 + $0x1], 1 }

</bundles_post_ra>
